<compile_context>
chip_gen: v5e
topology: v5e:2x2
jax: 0.10.0
libtpu: 0.0.40
codegen_flags: <defaults>
</compile_context>

<pallas_src>
import functools

import jax
import jax.numpy as jnp
from jax.experimental import pallas as pl
from jax.experimental.pallas import tpu as pltpu


def _round_up(x, m):
    return (x + m - 1) // m * m


def _cnf_layer2_kernel(a_l2c_ref, a_c2l_ref, lit_ref, cf_ref,
                       wl_ref, bl_ref, wc_ref, wf_ref, bc_ref,
                       out_ref, m_ref):
    """Fused CNFLayer2 forward.

    Grid: 1-D over tiles of destination LITERAL rows ("arbitrary" -- step 0 fills
    the persistent VMEM scratch m_ref that every later step reads).

    a_l2c_ref : [C_pad, L_pad]        bf16, resident (clause x literal incidence)
    a_c2l_ref : [tile_lit, C_pad]     bf16, tile of literal x clause incidence
    lit_ref   : [L_pad, in_size]      f32 literal features
    cf_ref    : [C_pad, 1]            f32 clause features
    wl_ref    : [in_size, clause_size]   W_l2c^T
    bl_ref    : [1, clause_size]
    wc_ref    : [clause_size, out_size]  first clause_size rows of W_c2l^T
    wf_ref    : [1, out_size]            last row of W_c2l^T (clause-feat column)
    bc_ref    : [1, out_size]
    out_ref   : [tile_lit, out_size]
    m_ref     : VMEM scratch [C_pad, out_size] -- fused clause-side intermediate.
    """
    @pl.when(pl.program_id(0) == 0)
    def _phase1():
        # Reassociated: (A @ X) @ W == A @ (X @ W); tiny feature matmul first.
        lit_w = jnp.dot(lit_ref[...], wl_ref[...],
                        preferred_element_type=jnp.float32)
        agg = jnp.dot(a_l2c_ref[...].astype(jnp.float32), lit_w,
                      preferred_element_type=jnp.float32)
        cembs = jnp.maximum(agg + bl_ref[...], 0.0)
        # Split-concat: [cembs | clause_feat] @ W_c2l^T
        #   == cembs @ W_c  +  clause_feat * w_f   (rank-1 broadcast, VPU)
        m_ref[...] = (jnp.dot(cembs, wc_ref[...],
                              preferred_element_type=jnp.float32)
                      + cf_ref[...] * wf_ref[...])

    # Phase 2 (every literal-row tile): lembs = relu(A_c2l @ M + b_c2l)
    z = jnp.dot(a_c2l_ref[...].astype(jnp.float32), m_ref[...],
                preferred_element_type=jnp.float32) + bc_ref[...]
    out_ref[...] = jnp.maximum(z, 0.0).astype(out_ref.dtype)


def cnf_layer2_forward(params, a_l2c, a_c2l, lit_feat, clause_feat):
    """Forward pass of CNFLayer2 (returns lembs [n_lit, out_size])."""
    w_l2c_t, b_l2c, w_c2l_t, b_c2l = params
    n_clause, n_lit = a_l2c.shape
    in_size = lit_feat.shape[1]
    clause_size = w_l2c_t.shape[1]
    out_size = w_c2l_t.shape[1]

    # Split W_c2l^T so the 33-wide concat is never materialized.
    w_c = w_c2l_t[:clause_size, :].astype(jnp.float32)          # [clause_size, out_size]
    w_f = w_c2l_t[clause_size:clause_size + 1, :].astype(jnp.float32)  # [1, out_size]

    # ---- tiling / padding (arbitrary node counts, lane/sublane friendly) ----
    tile_lit = min(512, _round_up(n_lit, 128))
    l_pad = _round_up(n_lit, tile_lit)
    c_pad = _round_up(n_clause, 128)

    # Zero padding: padded adjacency rows/cols are 0 so real-row sums are unchanged.
    a_l2c_p = jnp.pad(a_l2c, ((0, c_pad - n_clause), (0, l_pad - n_lit))).astype(jnp.bfloat16)
    a_c2l_p = jnp.pad(a_c2l, ((0, l_pad - n_lit), (0, c_pad - n_clause))).astype(jnp.bfloat16)
    lit_p = jnp.pad(lit_feat.astype(jnp.float32), ((0, l_pad - n_lit), (0, 0)))
    cf_p = jnp.pad(clause_feat.astype(jnp.float32), ((0, c_pad - n_clause), (0, 0)))

    b_l2c2 = b_l2c.reshape(1, clause_size).astype(jnp.float32)
    b_c2l2 = b_c2l.reshape(1, out_size).astype(jnp.float32)

    grid = (l_pad // tile_lit,)

    # VMEM budget: resident a_l2c + double-buffered a_c2l tile + features + scratch.
    vmem_est = (a_l2c_p.size * 2                     # resident l2c incidence (bf16)
                + 2 * tile_lit * c_pad * 2           # double-buffered c2l tile (bf16)
                + lit_p.size * 4 + cf_p.size * 4     # resident features
                + c_pad * out_size * 4               # M scratch
                + 2 * tile_lit * out_size * 4        # output tiles
                + (4 << 20))                         # weights / headroom
    vmem_limit = max(int(vmem_est), 32 * 1024 * 1024)  # fits v7x's 64 MiB at demo sizes

    out_pad = pl.pallas_call(
        _cnf_layer2_kernel,
        out_shape=jax.ShapeDtypeStruct((l_pad, out_size), jnp.float32),
        grid=grid,
        in_specs=[
            pl.BlockSpec((c_pad, l_pad), lambda i: (0, 0)),        # a_l2c (resident)
            pl.BlockSpec((tile_lit, c_pad), lambda i: (i, 0)),     # a_c2l tile
            pl.BlockSpec((l_pad, in_size), lambda i: (0, 0)),      # literal feats
            pl.BlockSpec((c_pad, 1), lambda i: (0, 0)),            # clause feats
            pl.BlockSpec((in_size, clause_size), lambda i: (0, 0)),  # W_l2c^T
            pl.BlockSpec((1, clause_size), lambda i: (0, 0)),        # b_l2c
            pl.BlockSpec((clause_size, out_size), lambda i: (0, 0)),  # W_c
            pl.BlockSpec((1, out_size), lambda i: (0, 0)),             # w_f
            pl.BlockSpec((1, out_size), lambda i: (0, 0)),             # b_c2l
        ],
        out_specs=pl.BlockSpec((tile_lit, out_size), lambda i: (i, 0)),
        scratch_shapes=[pltpu.VMEM((c_pad, out_size), jnp.float32)],
        compiler_params=pltpu.CompilerParams(
            # "arbitrary": every tile depends on the step-0 scratch fill.
            dimension_semantics=("arbitrary",),
            vmem_limit_bytes=vmem_limit,
        ),
    )(a_l2c_p, a_c2l_p, lit_p, cf_p,
      w_l2c_t.astype(jnp.float32), b_l2c2, w_c, w_f, b_c2l2)

    return out_pad[:n_lit]


def init_params(key, in_size, clause_size, out_size):
    """Deterministic synthetic init for the two nn.Linear layers."""
    k1, k2, k3, k4 = jax.random.split(key, 4)
    # PyTorch Linear stores W as [out, in]; kernel consumes W^T ([in, out]).
    w_l2c = jax.random.normal(k1, (clause_size, in_size), jnp.float32) * 0.1
    b_l2c = jax.random.normal(k2, (clause_size,), jnp.float32) * 0.1
    w_c2l = jax.random.normal(k3, (out_size, clause_size + 1), jnp.float32) * 0.1
    b_c2l = jax.random.normal(k4, (out_size,), jnp.float32) * 0.1
    return (w_l2c.T, b_l2c, w_c2l.T, b_c2l)


def reference_forward(params, a_l2c, a_c2l, lit_feat, clause_feat):
    """Pure-JAX reference (mirrors the PyTorch forward exactly, with the concat)."""
    w_l2c_t, b_l2c, w_c2l_t, b_c2l = params
    clause_h = a_l2c @ lit_feat
    cembs = jax.nn.relu(clause_h @ w_l2c_t + b_l2c)
    wh_c2l = jnp.concatenate([cembs, clause_feat], axis=1)
    lit_h = a_c2l @ wh_c2l
    return jax.nn.relu(lit_h @ w_c2l_t + b_c2l)


if __name__ == "__main__":
    in_size, clause_size, out_size = 32, 32, 32
    n_lit, n_clause = 16, 8

    key = jax.random.PRNGKey(0)
    k_param, k_lit, k_cls, k_adj1, _ = jax.random.split(key, 5)

    params = init_params(k_param, in_size, clause_size, out_size)

    lit_feat = jax.random.normal(k_lit, (n_lit, in_size), jnp.float32)
    clause_feat = jax.random.normal(k_cls, (n_clause, 1), jnp.float32)
    # Bipartite CNF graph as dense incidence matrices (c2l is the transpose relation).
    a_l2c = jax.random.bernoulli(k_adj1, 0.3, (n_clause, n_lit)).astype(jnp.float32)
    a_c2l = a_l2c.T

    fwd = jax.jit(functools.partial(cnf_layer2_forward, params))
    lembs = fwd(a_l2c, a_c2l, lit_feat, clause_feat)
    jax.block_until_ready(lembs)

    ref = reference_forward(params, a_l2c, a_c2l, lit_feat, clause_feat)
    assert lembs.shape == (n_lit, out_size)
    # Tolerance slightly relaxed vs 1e-5: the kernel reassociates the matmul chain
    # (exact in infinite precision, ~1e-7 relative fp reordering difference).
    assert jnp.allclose(lembs, ref, atol=1e-4, rtol=1e-4), (
        float(jnp.max(jnp.abs(lembs - ref))))

    print("KERNEL_OK")
</pallas_src>

<mosaic_0001>
module attributes {stable_mosaic.version = 11 : i64} {
  func.func @_cnf_layer2_kernel(%arg0: i32, %arg1: memref<128x128xbf16, #tpu.memory_space<vmem>>, %arg2: memref<128x128xbf16, #tpu.memory_space<vmem>>, %arg3: memref<128x32xf32, #tpu.memory_space<vmem>>, %arg4: memref<128x1xf32, #tpu.memory_space<vmem>>, %arg5: memref<32x32xf32, #tpu.memory_space<vmem>>, %arg6: memref<1x32xf32, #tpu.memory_space<vmem>>, %arg7: memref<32x32xf32, #tpu.memory_space<vmem>>, %arg8: memref<1x32xf32, #tpu.memory_space<vmem>>, %arg9: memref<1x32xf32, #tpu.memory_space<vmem>>, %arg10: memref<128x32xf32, #tpu.memory_space<vmem>>, %arg11: memref<128x32xf32, #tpu.memory_space<vmem>>) attributes {dimension_semantics = [#tpu.dimension_semantics<arbitrary>], iteration_bounds = array<i64: 1>, scalar_prefetch = 0 : i64, scratch_operands = 1 : i64, tpu.core_type = #tpu.core_type<tc>, window_params = [{pipeline_mode = #tpu.pipeline_mode<synchronous>, transform_indices = @transform_0, window_bounds = array<i64: 128, 128>}, {transform_indices = @transform_1, window_bounds = array<i64: 128, 128>}, {pipeline_mode = #tpu.pipeline_mode<synchronous>, transform_indices = @transform_2, window_bounds = array<i64: 128, 32>}, {pipeline_mode = #tpu.pipeline_mode<synchronous>, transform_indices = @transform_3, window_bounds = array<i64: 128, 1>}, {pipeline_mode = #tpu.pipeline_mode<synchronous>, transform_indices = @transform_4, window_bounds = array<i64: 32, 32>}, {pipeline_mode = #tpu.pipeline_mode<synchronous>, transform_indices = @transform_5, window_bounds = array<i64: 1, 32>}, {pipeline_mode = #tpu.pipeline_mode<synchronous>, transform_indices = @transform_6, window_bounds = array<i64: 32, 32>}, {pipeline_mode = #tpu.pipeline_mode<synchronous>, transform_indices = @transform_7, window_bounds = array<i64: 1, 32>}, {pipeline_mode = #tpu.pipeline_mode<synchronous>, transform_indices = @transform_8, window_bounds = array<i64: 1, 32>}, {transform_indices = @transform_9, window_bounds = array<i64: 128, 32>}]} {
    %c0_i32 = arith.constant 0 : i32
    %0 = arith.cmpi eq, %arg0, %c0_i32 : i32
    %1 = arith.extui %0 : i1 to i32
    %c0_i32_0 = arith.constant 0 : i32
    %2 = arith.cmpi ne, %1, %c0_i32_0 : i32
    scf.if %2 {
      %c0_9 = arith.constant 0 : index
      %c0_10 = arith.constant 0 : index
      %13 = vector.load %arg3[%c0_9, %c0_10] : memref<128x32xf32, #tpu.memory_space<vmem>>, vector<128x32xf32>
      %c0_11 = arith.constant 0 : index
      %c0_12 = arith.constant 0 : index
      %14 = vector.load %arg5[%c0_11, %c0_12] : memref<32x32xf32, #tpu.memory_space<vmem>>, vector<32x32xf32>
      %cst_13 = arith.constant dense<0.000000e+00> : vector<128x32xf32>
      %15 = tpu.matmul %13, %14, %cst_13 {dimension_numbers = #tpu.dot_dimension_numbers<[1], [0], [0], [1], [0, 0, 1, 1], [], []>} : vector<128x32xf32>, vector<32x32xf32>, vector<128x32xf32> -> vector<128x32xf32>
      %c0_14 = arith.constant 0 : index
      %c0_15 = arith.constant 0 : index
      %16 = vector.load %arg1[%c0_14, %c0_15] : memref<128x128xbf16, #tpu.memory_space<vmem>>, vector<128x128xbf16>
      %17 = arith.extf %16 : vector<128x128xbf16> to vector<128x128xf32>
      %cst_16 = arith.constant dense<0.000000e+00> : vector<128x32xf32>
      %18 = tpu.matmul %17, %15, %cst_16 {dimension_numbers = #tpu.dot_dimension_numbers<[1], [0], [0], [1], [0, 0, 1, 1], [], []>} : vector<128x128xf32>, vector<128x32xf32>, vector<128x32xf32> -> vector<128x32xf32>
      %c0_17 = arith.constant 0 : index
      %c0_18 = arith.constant 0 : index
      %19 = vector.load %arg6[%c0_17, %c0_18] : memref<1x32xf32, #tpu.memory_space<vmem>>, vector<1x32xf32>
      %20 = vector.broadcast %19 : vector<1x32xf32> to vector<128x32xf32>
      %21 = arith.addf %18, %20 : vector<128x32xf32>
      %cst_19 = arith.constant 0.000000e+00 : f32
      %22 = vector.broadcast %cst_19 : f32 to vector<128x32xf32>
      %23 = arith.maximumf %21, %22 : vector<128x32xf32>
      %c0_20 = arith.constant 0 : index
      %c0_21 = arith.constant 0 : index
      %24 = vector.load %arg7[%c0_20, %c0_21] : memref<32x32xf32, #tpu.memory_space<vmem>>, vector<32x32xf32>
      %cst_22 = arith.constant dense<0.000000e+00> : vector<128x32xf32>
      %25 = tpu.matmul %23, %24, %cst_22 {dimension_numbers = #tpu.dot_dimension_numbers<[1], [0], [0], [1], [0, 0, 1, 1], [], []>} : vector<128x32xf32>, vector<32x32xf32>, vector<128x32xf32> -> vector<128x32xf32>
      %c0_23 = arith.constant 0 : index
      %c0_24 = arith.constant 0 : index
      %26 = vector.load %arg4[%c0_23, %c0_24] : memref<128x1xf32, #tpu.memory_space<vmem>>, vector<128x1xf32>
      %c0_25 = arith.constant 0 : index
      %c0_26 = arith.constant 0 : index
      %27 = vector.load %arg8[%c0_25, %c0_26] : memref<1x32xf32, #tpu.memory_space<vmem>>, vector<1x32xf32>
      %28 = vector.broadcast %26 : vector<128x1xf32> to vector<128x32xf32>
      %29 = vector.broadcast %27 : vector<1x32xf32> to vector<128x32xf32>
      %30 = arith.mulf %28, %29 : vector<128x32xf32>
      %31 = arith.addf %25, %30 : vector<128x32xf32>
      %c0_27 = arith.constant 0 : index
      %c0_28 = arith.constant 0 : index
      %32 = vector.load %arg11[%c0_27, %c0_28] : memref<128x32xf32, #tpu.memory_space<vmem>>, vector<128x32xf32>
      tpu.vector_store %arg11[%c0_27, %c0_28], %31 {strides = array<i32>} : memref<128x32xf32, #tpu.memory_space<vmem>>, vector<128x32xf32>,
    } else {
    }
    %c0 = arith.constant 0 : index
    %c0_1 = arith.constant 0 : index
    %3 = vector.load %arg2[%c0, %c0_1] : memref<128x128xbf16, #tpu.memory_space<vmem>>, vector<128x128xbf16>
    %4 = arith.extf %3 : vector<128x128xbf16> to vector<128x128xf32>
    %c0_2 = arith.constant 0 : index
    %c0_3 = arith.constant 0 : index
    %5 = vector.load %arg11[%c0_2, %c0_3] : memref<128x32xf32, #tpu.memory_space<vmem>>, vector<128x32xf32>
    %cst = arith.constant dense<0.000000e+00> : vector<128x32xf32>
    %6 = tpu.matmul %4, %5, %cst {dimension_numbers = #tpu.dot_dimension_numbers<[1], [0], [0], [1], [0, 0, 1, 1], [], []>} : vector<128x128xf32>, vector<128x32xf32>, vector<128x32xf32> -> vector<128x32xf32>
    %c0_4 = arith.constant 0 : index
    %c0_5 = arith.constant 0 : index
    %7 = vector.load %arg9[%c0_4, %c0_5] : memref<1x32xf32, #tpu.memory_space<vmem>>, vector<1x32xf32>
    %8 = vector.broadcast %7 : vector<1x32xf32> to vector<128x32xf32>
    %9 = arith.addf %6, %8 : vector<128x32xf32>
    %cst_6 = arith.constant 0.000000e+00 : f32
    %10 = vector.broadcast %cst_6 : f32 to vector<128x32xf32>
    %11 = arith.maximumf %9, %10 : vector<128x32xf32>
    %c0_7 = arith.constant 0 : index
    %c0_8 = arith.constant 0 : index
    %12 = vector.load %arg10[%c0_7, %c0_8] : memref<128x32xf32, #tpu.memory_space<vmem>>, vector<128x32xf32>
    tpu.vector_store %arg10[%c0_7, %c0_8], %11 {strides = array<i32>} : memref<128x32xf32, #tpu.memory_space<vmem>>, vector<128x32xf32>,
    return
  }
  func.func @transform_0(%arg0: i32) -> (i32, i32) {
    %c0_i32 = arith.constant 0 : i32
    %c0_i32_0 = arith.constant 0 : i32
    %c0_i32_1 = arith.constant 0 : i32
    return %c0_i32, %c0_i32_0 : i32, i32
  }
  func.func @transform_1(%arg0: i32) -> (i32, i32) {
    %c0_i32 = arith.constant 0 : i32
    %c0_i32_0 = arith.constant 0 : i32
    return %arg0, %c0_i32 : i32, i32
  }
  func.func @transform_2(%arg0: i32) -> (i32, i32) {
    %c0_i32 = arith.constant 0 : i32
    %c0_i32_0 = arith.constant 0 : i32
    %c0_i32_1 = arith.constant 0 : i32
    return %c0_i32, %c0_i32_0 : i32, i32
  }
  func.func @transform_3(%arg0: i32) -> (i32, i32) {
    %c0_i32 = arith.constant 0 : i32
    %c0_i32_0 = arith.constant 0 : i32
    %c0_i32_1 = arith.constant 0 : i32
    return %c0_i32, %c0_i32_0 : i32, i32
  }
  func.func @transform_4(%arg0: i32) -> (i32, i32) {
    %c0_i32 = arith.constant 0 : i32
    %c0_i32_0 = arith.constant 0 : i32
    %c0_i32_1 = arith.constant 0 : i32
    return %c0_i32, %c0_i32_0 : i32, i32
  }
  func.func @transform_5(%arg0: i32) -> (i32, i32) {
    %c0_i32 = arith.constant 0 : i32
    %c0_i32_0 = arith.constant 0 : i32
    %c0_i32_1 = arith.constant 0 : i32
    return %c0_i32, %c0_i32_0 : i32, i32
  }
  func.func @transform_6(%arg0: i32) -> (i32, i32) {
    %c0_i32 = arith.constant 0 : i32
    %c0_i32_0 = arith.constant 0 : i32
    %c0_i32_1 = arith.constant 0 : i32
    return %c0_i32, %c0_i32_0 : i32, i32
  }
  func.func @transform_7(%arg0: i32) -> (i32, i32) {
    %c0_i32 = arith.constant 0 : i32
    %c0_i32_0 = arith.constant 0 : i32
    %c0_i32_1 = arith.constant 0 : i32
    return %c0_i32, %c0_i32_0 : i32, i32
  }
  func.func @transform_8(%arg0: i32) -> (i32, i32) {
    %c0_i32 = arith.constant 0 : i32
    %c0_i32_0 = arith.constant 0 : i32
    %c0_i32_1 = arith.constant 0 : i32
    return %c0_i32, %c0_i32_0 : i32, i32
  }
  func.func @transform_9(%arg0: i32) -> (i32, i32) {
    %c0_i32 = arith.constant 0 : i32
    %c0_i32_0 = arith.constant 0 : i32
    return %arg0, %c0_i32 : i32, i32
  }
}

</mosaic_0001>

<bundles_post_ra>
// kernel: cnf_layer2_forward.1
= control target key start
LH: loop header
LB: loop body
LE: loop exit
PB: predicated region body
PF: predicated region fallthrough
CT: control target
= control target key end

     0   :  { %vm56_vm0 = vcmask 261120   ;;  %v839_v53 = vmov 0   ;;  %s1245_s4 = inlined_call_operand.vmem [shape: f32[32,32], index: 4, kind: input, shape index: {}]   ;;  %s1246_s2 = inlined_call_operand.vmem [shape: f32[128,32], index: 2, kind: input, shape index: {}]   ;;  %s1247_s5 = inlined_call_operand.vmem [shape: f32[1,32], index: 5, kind: input, shape index: {}]   ;;  %s1248_s0 = inlined_call_operand.vmem [shape: bf16[128,128], index: 0, kind: input, shape index: {}]   ;;  %s1249_s3 = inlined_call_operand.vmem [shape: f32[128,1], index: 3, kind: input, shape index: {}]   ;;  %s1250_s6 = inlined_call_operand.vmem [shape: f32[32,32], index: 6, kind: input, shape index: {}]   ;;  %s1251_s7 = inlined_call_operand.vmem [shape: f32[1,32], index: 7, kind: input, shape index: {}]   ;;  %s1252_s8 = inlined_call_operand.vmem [shape: f32[1,32], index: 8, kind: input, shape index: {}]   ;;  %s1253_s1 = inlined_call_operand.vmem [shape: bf16[128,128], index: 1, kind: input, shape index: {}]   ;;  %s1254_s9 = inlined_call_operand.vmem [shape: f32[128,32], index: 9, kind: output, shape index: {}]  }
   0x1   :  { %v55_v0 = vld [vmem:[%s1245_s4 + $0x18] sm:$0xff]  ;;  %v54_v1 = vld [vmem:[%s1245_s4 + $0x10] sm:$0xff]  ;;  %v53_v2 = vld [vmem:[%s1245_s4 + $0x8] sm:$0xff]  ;;  %833 = vset.pattern.permute.xlu0 %v839_v53  ;;  %834 = vset.pattern.permute.xlu1 %v839_v53 }
   0x2   :  { %117 = vmatpush.msra.mxu0 %v55_v0  ;;  %v52_v3 = vld [vmem:[%s1245_s4] sm:$0xff]  ;;  %v37_v5 = vld [vmem:[%s1246_s2 + $0x8] sm:$0xff]  ;;  %v38_v6 = vld [vmem:[%s1246_s2 + $0x10] sm:$0xff]  ;;  %835 = vset.pattern.permute.xlu2 %v839_v53 }
   0x3   :  { %v36_v4 = vld [vmem:[%s1246_s2] sm:$0xff]  ;;  %v39_v7 = vld [vmem:[%s1246_s2 + $0x18] sm:$0xff]  ;;  %v41_v9 = vld [vmem:[%s1246_s2 + $0x28] sm:$0xff] }
   0x4   :  { %118 = vmatpush.msra.mxu0 %v54_v1  ;;  %v40_v8 = vld [vmem:[%s1246_s2 + $0x20] sm:$0xff]  ;;  %v42_v10 = vld [vmem:[%s1246_s2 + $0x30] sm:$0xff]  ;;  %v43_v11 = vld [vmem:[%s1246_s2 + $0x38] sm:$0xff] }
   0x5   :  { %v44_v12 = vld [vmem:[%s1246_s2 + $0x40] sm:$0xff]  ;;  %v45_v13 = vld [vmem:[%s1246_s2 + $0x48] sm:$0xff]  ;;  %v46_v14 = vld [vmem:[%s1246_s2 + $0x50] sm:$0xff] }
   0x6   :  { %119 = vmatpush.msra.mxu0 %v53_v2  ;;  %v47_v15 = vld [vmem:[%s1246_s2 + $0x58] sm:$0xff]  ;;  %v48_v16 = vld [vmem:[%s1246_s2 + $0x60] sm:$0xff]  ;;  %v49_v17 = vld [vmem:[%s1246_s2 + $0x68] sm:$0xff] }
   0x7   :  { %v50_v18 = vld [vmem:[%s1246_s2 + $0x70] sm:$0xff]  ;;  %v51_v19 = vld [vmem:[%s1246_s2 + $0x78] sm:$0xff]  ;;  %v723_v36 = vld [vmem:[%s1248_s0] sm:$0xff]  }
   0x8   :  { %120 = vmatpush.msra.mxu0 %v52_v3  ;;  %v724_v37 = vunpack.c.l.bf16 %v723_v36  ;;  %v725_v38 = vunpack.c.h.bf16 %v723_v36  ;;  %v786_v39 = vld [vmem:[%s1248_s0 + $0x8] sm:$0xff]   ;;  %v787_v42 = vld [vmem:[%s1248_s0 + $0x10] sm:$0xff]   ;;  %v788_v45 = vld [vmem:[%s1248_s0 + $0x18] sm:$0xff]  }
   0x9   :  { %690 = vmatmul.msk.f32.vlgmr.msra.gmra.mxu0 %vm56_vm0, %v36_v4  ;;  %v728_v40 = vunpack.c.l.bf16 %v786_v39  ;;  %v729_v41 = vunpack.c.h.bf16 %v786_v39  ;;  %v732_v43 = vunpack.c.l.bf16 %v787_v42  ;;  %v733_v44 = vunpack.c.h.bf16 %v787_v42  ;;  %v789_v48 = vld [vmem:[%s1248_s0 + $0x20] sm:$0xff]   ;;  %v790_v51 = vld [vmem:[%s1248_s0 + $0x28] sm:$0xff]   ;;  %v306_v54 = vld [vmem:[%s1249_s3 + $0x78] sm:$0xff] }
   0xa   :  { %v736_v46 = vunpack.c.l.bf16 %v788_v45  ;;  %v737_v47 = vunpack.c.h.bf16 %v788_v45  ;;  %v740_v49 = vunpack.c.l.bf16 %v789_v48  ;;  %v741_v50 = vunpack.c.h.bf16 %v789_v48  ;;  %385 = vperm.xlu0 %833, %v306_v54   ;;  %v290_v56 = vld [vmem:[%s1250_s6 + $0x18] sm:$0xff]  ;;  %v305_v57 = vld [vmem:[%s1249_s3 + $0x70] sm:$0xff]  ;;  %v300_v60 = vld [vmem:[%s1249_s3 + $0x48] sm:$0xff] }
   0xb   :  { %v744_v52 = vunpack.c.l.bf16 %v790_v51  ;;  %v745_v55 = vunpack.c.h.bf16 %v790_v51  ;;  %v791_v58 = vld [vmem:[%s1248_s0 + $0x30] sm:$0xff]   ;;  %467 = vmatpush.msra.mxu2 %v290_v56  ;;  %v288_v63 = vld [vmem:[%s1250_s6 + $0x8] sm:$0xff]  ;;  %v287_v0 = vld [vmem:[%s1250_s6] sm:$0xff] }
   0xc   :  { %v748_v59 = vunpack.c.l.bf16 %v791_v58  ;;  %v749_v61 = vunpack.c.h.bf16 %v791_v58  ;;  %v289_v62 = vld [vmem:[%s1250_s6 + $0x10] sm:$0xff]  ;;  %v304_v1 = vld [vmem:[%s1249_s3 + $0x68] sm:$0xff]  ;;  %v792_v3 = vld [vmem:[%s1248_s0 + $0x38] sm:$0xff]  }
   0xd   :  { %468 = vmatpush.msra.mxu2 %v289_v62  ;;  %v297_v2 = vld [vmem:[%s1249_s3 + $0x30] sm:$0xff]  ;;  %375 = vperm.xlu1 %834, %v304_v1   ;;  %v752_v4 = vunpack.c.l.bf16 %v792_v3 }
   0xf   :  { %469 = vmatpush.msra.mxu2 %v288_v63 }
  0x11   :  { %691 = vmatmul.msk.f32.gmra.mxu0 %vm56_vm0, %v37_v5  ;;  %470 = vmatpush.msra.mxu2 %v287_v0  ;;  %v303_v5 = vld [vmem:[%s1249_s3 + $0x60] sm:$0xff] }
  0x12   :  { %380 = vperm.xlu0 %833, %v305_v57  }
  0x15   :  { %370 = vperm.xlu1 %834, %v303_v5  }
  0x19   :  { %692 = vmatmul.msk.f32.gmra.mxu0 %vm56_vm0, %v38_v6  ;;  %v294_v6 = vld [vmem:[%s1249_s3 + $0x18] sm:$0xff] }
  0x1a   :  { %355 = vperm.xlu0 %833, %v300_v60  }
  0x21   :  { %693 = vmatmul.msk.f32.gmra.mxu0 %vm56_vm0, %v39_v7  ;;  %v753_v7 = vunpack.c.h.bf16 %v792_v3 }
  0x22   :  { %340 = vperm.xlu0 %833, %v297_v2  }
  0x29   :  { %694 = vmatmul.msk.f32.gmra.mxu0 %vm56_vm0, %v40_v8  ;;  %v302_v8 = vld [vmem:[%s1249_s3 + $0x58] sm:$0xff] }
  0x2a   :  { %325 = vperm.xlu0 %833, %v294_v6   ;;  %365 = vperm.xlu2 %835, %v302_v8  }
  0x31   :  { %695 = vmatmul.msk.f32.gmra.mxu0 %vm56_vm0, %v41_v9  ;;  %v299_v9 = vld [vmem:[%s1249_s3 + $0x40] sm:$0xff] }
  0x32   :  { %350 = vperm.xlu1 %834, %v299_v9  }
  0x39   :  { %696 = vmatmul.msk.f32.gmra.mxu0 %vm56_vm0, %v42_v10  ;;  %v291_v10 = vld [vmem:[%s1249_s3] sm:$0xff] }
  0x3a   :  { %310 = vperm.xlu0 %833, %v291_v10  }
  0x41   :  { %697 = vmatmul.msk.f32.gmra.mxu0 %vm56_vm0, %v43_v11  ;;  %v301_v11 = vld [vmem:[%s1249_s3 + $0x50] sm:$0xff] }
  0x42   :  { %360 = vperm.xlu2 %835, %v301_v11  }
  0x49   :  { %698 = vmatmul.msk.f32.gmra.mxu0 %vm56_vm0, %v44_v12  ;;  %v296_v12 = vld [vmem:[%s1249_s3 + $0x28] sm:$0xff] }
  0x4a   :  { %335 = vperm.xlu1 %834, %v296_v12  }
  0x51   :  { %699 = vmatmul.msk.f32.gmra.mxu0 %vm56_vm0, %v45_v13  ;;  %v1041_v13 = vld [vmem:[%s1247_s5] ss:$0 sm:$0xff] }
  0x59   :  { %700 = vmatmul.msk.f32.gmra.mxu0 %vm56_vm0, %v46_v14 }
  0x61   :  { %701 = vmatmul.msk.f32.gmra.mxu0 %vm56_vm0, %v47_v15 }
  0x69   :  { %702 = vmatmul.msk.f32.gmra.mxu0 %vm56_vm0, %v48_v16 }
  0x71   :  { %703 = vmatmul.msk.f32.gmra.mxu0 %vm56_vm0, %v49_v17 }
  0x79   :  { %704 = vmatmul.msk.f32.gmra.mxu0 %vm56_vm0, %v50_v18  ;;  %v298_v18 = vld [vmem:[%s1249_s3 + $0x38] sm:$0xff] }
  0x7a   :  { %345 = vperm.xlu2 %835, %v298_v18  }
  0x7c   :  { %v1076_v51 = vpop.permute.xlu0 %385 }
  0x7f   :  { %v1088_v1 = vpop.permute.xlu1 %375 }
  0x81   :  { %705 = vmatmul.msk.f32.gmra.mxu0 %vm56_vm0, %v51_v19  ;;  %v293_v19 = vld [vmem:[%s1249_s3 + $0x10] sm:$0xff] }
  0x82   :  { %320 = vperm.xlu1 %834, %v293_v19  }
  0x84   :  { %v1080_v56 = vpop.permute.xlu0 %380  ;;  %v1084_v60 = vpop.permute.xlu2 %365 }
  0x86   :  { %v122_v20 = vpop.f32.mrf.mxu0 }
  0x8e   :  { %v125_v21 = vpop.f32.mrf.mxu0 }
  0x96   :  { %v128_v22 = vpop.f32.mrf.mxu0 }
  0x9c   :  { %v361_v2 = vpop.permute.xlu2 %360 }
  0x9e   :  { %v131_v23 = vpop.f32.mrf.mxu0 }
  0xa6   :  { %v134_v24 = vpop.f32.mrf.mxu0 }
  0xae   :  { %v137_v25 = vpop.f32.mrf.mxu0 }
  0xb6   :  { %v140_v26 = vpop.f32.mrf.mxu0 }
  0xbe   :  { %v143_v27 = vpop.f32.mrf.mxu0 }
  0xc6   :  { %v146_v28 = vpop.f32.mrf.mxu0 }
  0xce   :  { %v149_v29 = vpop.f32.mrf.mxu0 }
  0xd4   :  { %v346_v9 = vpop.permute.xlu2 %345 }
  0xd6   :  { %v152_v30 = vpop.f32.mrf.mxu0 }
  0xde   :  { %v155_v31 = vpop.f32.mrf.mxu0 }
  0xe6   :  { %v158_v32 = vpop.f32.mrf.mxu0 }
  0xee   :  { %v161_v33 = vpop.f32.mrf.mxu0 }
  0xf6   :  { %v164_v34 = vpop.f32.mrf.mxu0 }
  0xfe   :  { %v167_v35 = vpop.f32.mrf.mxu0 }
  0xff   :  { %206 = vmatpush.msrb.mxu0 %v167_v35  ;;  %800 = vmatpush.msra.mxu1 %v167_v35 }
 0x101   :  { %207 = vmatpush.msrb.mxu0 %v164_v34  ;;  %801 = vmatpush.msra.mxu1 %v164_v34 }
 0x103   :  { %208 = vmatpush.msrb.mxu0 %v161_v33  ;;  %802 = vmatpush.msra.mxu1 %v161_v33 }
 0x105   :  { %209 = vmatpush.msrb.mxu0 %v158_v32  ;;  %803 = vmatpush.msra.mxu1 %v158_v32 }
 0x107   :  { %210 = vmatpush.msrb.mxu0 %v155_v31  ;;  %804 = vmatpush.msra.mxu1 %v155_v31 }
 0x109   :  { %211 = vmatpush.msrb.mxu0 %v152_v30  ;;  %805 = vmatpush.msra.mxu1 %v152_v30 }
 0x10b   :  { %212 = vmatpush.msrb.mxu0 %v149_v29  ;;  %806 = vmatpush.msra.mxu1 %v149_v29 }
 0x10d   :  { %213 = vmatpush.msrb.mxu0 %v146_v28  ;;  %807 = vmatpush.msra.mxu1 %v146_v28 }
 0x10f   :  { %214 = vmatpush.msrb.mxu0 %v143_v27  ;;  %808 = vmatpush.msra.mxu1 %v143_v27  ;;  %v292_v27 = vld [vmem:[%s1249_s3 + $0x8] sm:$0xff] }
 0x111   :  { %215 = vmatpush.msrb.mxu0 %v140_v26  ;;  %809 = vmatpush.msra.mxu1 %v140_v26 }
 0x113   :  { %216 = vmatpush.msrb.mxu0 %v137_v25  ;;  %810 = vmatpush.msra.mxu1 %v137_v25 }
 0x115   :  { %217 = vmatpush.msrb.mxu0 %v134_v24  ;;  %811 = vmatpush.msra.mxu1 %v134_v24 }
 0x117   :  { %218 = vmatpush.msrb.mxu0 %v131_v23  ;;  %812 = vmatpush.msra.mxu1 %v131_v23  ;;  %v295_v23 = vld [vmem:[%s1249_s3 + $0x20] sm:$0xff] }
 0x118   :  { %330 = vperm.xlu2 %835, %v295_v23  }
 0x119   :  { %219 = vmatpush.msrb.mxu0 %v128_v22  ;;  %813 = vmatpush.msra.mxu1 %v128_v22 }
 0x11b   :  { %220 = vmatpush.msrb.mxu0 %v125_v21  ;;  %814 = vmatpush.msra.mxu1 %v125_v21 }
 0x11d   :  { %221 = vmatpush.msrb.mxu0 %v122_v20  ;;  %815 = vmatpush.msra.mxu1 %v122_v20 }
 0x11e   :  { %222 = vmatmul.f32.vlgmr.msrb.gmra.mxu0 %v724_v37  ;;  %225 = vmatmul.f32.vlgmr.msra.gmra.mxu1 %v725_v38 }
 0x120   :  { %315 = vperm.xlu2 %835, %v292_v27  }
 0x126   :  { %228 = vmatmul.f32.gmra.mxu1 %v728_v40 }
 0x12e   :  { %231 = vmatmul.f32.gmra.mxu1 %v729_v41 }
 0x136   :  { %234 = vmatmul.f32.gmra.mxu1 %v732_v43 }
 0x13e   :  { %237 = vmatmul.f32.gmra.mxu1 %v733_v44 }
 0x146   :  { %240 = vmatmul.f32.gmra.mxu1 %v736_v46 }
 0x14e   :  { %243 = vmatmul.f32.gmra.mxu1 %v737_v47 }
 0x156   :  { %246 = vmatmul.f32.gmra.mxu1 %v740_v49 }
 0x15e   :  { %249 = vmatmul.f32.gmra.mxu1 %v741_v50 }
 0x166   :  { %252 = vmatmul.f32.gmra.mxu1 %v744_v52 }
 0x16e   :  { %255 = vmatmul.f32.gmra.mxu1 %v745_v55 }
 0x176   :  { %258 = vmatmul.f32.gmra.mxu1 %v748_v59 }
 0x17e   :  { %261 = vmatmul.f32.gmra.mxu1 %v749_v61  ;;  %v356_v61 = vpop.permute.xlu0 %355 }
 0x186   :  { %264 = vmatmul.f32.gmra.mxu1 %v752_v4  ;;  %v341_v4 = vpop.permute.xlu0 %340 }
 0x18e   :  { %267 = vmatmul.f32.gmra.mxu1 %v753_v7  ;;  %v371_v7 = vpop.permute.xlu1 %370  ;;  %v326_v10 = vpop.permute.xlu0 %325 }
 0x196   :  { %v351_v12 = vpop.permute.xlu1 %350 }
 0x19b   :  { %v223_v14 = vpop.f32.mrf.mxu0  ;;  %v226_v15 = vpop.f32.mrf.mxu1 }
 0x19c   :  { %v224_v16 = vadd.f32 %v1041_v13, %v223_v14  ;;  %v227_v20 = vadd.f32 %v1041_v13, %v226_v15  ;;  %v331_v14 = vpop.permute.xlu2 %330  ;;  %v1098_v15 = vld [vmem:[%s1251_s7] ss:$0 sm:$0xff] }
 0x19e   :  { %v271_v17 = vmax.f32 %v224_v16, 0.0  ;;  %v272_v22 = vmax.f32 %v227_v20, 0.0  ;;  %v311_v16 = vpop.permute.xlu0 %310  ;;  %v336_v19 = vpop.permute.xlu1 %335 }
 0x1a0   :  { %706 = vmatmul.msk.f32.vlgmr.msra.gmra.mxu2 %vm56_vm0, %v271_v17  ;;  %v391_v17 = vmul.f32 %v1098_v15, %v311_v16 }
 0x1a3   :  { %v229_v21 = vpop.f32.mrf.mxu1 }
 0x1a4   :  { %v230_v24 = vadd.f32 %v1041_v13, %v229_v21  ;;  %v316_v21 = vpop.permute.xlu2 %315 }
 0x1a6   :  { %v273_v26 = vmax.f32 %v230_v24, 0.0  ;;  %v321_v24 = vpop.permute.xlu1 %320 }
 0x1a8   :  { %707 = vmatmul.msk.f32.gmra.mxu2 %vm56_vm0, %v272_v22 }
 0x1ab   :  { %v232_v25 = vpop.f32.mrf.mxu1 }
 0x1ac   :  { %v233_v28 = vadd.f32 %v1041_v13, %v232_v25  ;;  %v393_v25 = vmul.f32 %v1098_v15, %v321_v24 }
 0x1ae   :  { %v274_v30 = vmax.f32 %v233_v28, 0.0  ;;  %v394_v28 = vmul.f32 %v1098_v15, %v326_v10 }
 0x1b0   :  { %708 = vmatmul.msk.f32.gmra.mxu2 %vm56_vm0, %v273_v26 }
 0x1b3   :  { %v235_v29 = vpop.f32.mrf.mxu1 }
 0x1b4   :  { %v236_v31 = vadd.f32 %v1041_v13, %v235_v29 }
 0x1b6   :  { %v275_v33 = vmax.f32 %v236_v31, 0.0  ;;  %v395_v31 = vmul.f32 %v1098_v15, %v331_v14 }
 0x1b8   :  { %709 = vmatmul.msk.f32.gmra.mxu2 %vm56_vm0, %v274_v30 }
 0x1bb   :  { %v238_v32 = vpop.f32.mrf.mxu1 }
 0x1bc   :  { %v239_v34 = vadd.f32 %v1041_v13, %v238_v32 }
 0x1be   :  { %v276_v36 = vmax.f32 %v239_v34, 0.0  ;;  %v396_v34 = vmul.f32 %v1098_v15, %v336_v19 }
 0x1c0   :  { %710 = vmatmul.msk.f32.gmra.mxu2 %vm56_vm0, %v275_v33 }
 0x1c3   :  { %v241_v35 = vpop.f32.mrf.mxu1 }
 0x1c4   :  { %v242_v37 = vadd.f32 %v1041_v13, %v241_v35 }
 0x1c6   :  { %v277_v39 = vmax.f32 %v242_v37, 0.0  ;;  %v397_v37 = vmul.f32 %v1098_v15, %v341_v4 }
 0x1c8   :  { %711 = vmatmul.msk.f32.gmra.mxu2 %vm56_vm0, %v276_v36 }
 0x1cb   :  { %v244_v38 = vpop.f32.mrf.mxu1 }
 0x1cc   :  { %v245_v40 = vadd.f32 %v1041_v13, %v244_v38 }
 0x1ce   :  { %v278_v42 = vmax.f32 %v245_v40, 0.0  ;;  %v398_v40 = vmul.f32 %v1098_v15, %v346_v9 }
 0x1d0   :  { %712 = vmatmul.msk.f32.gmra.mxu2 %vm56_vm0, %v277_v39 }
 0x1d3   :  { %v247_v41 = vpop.f32.mrf.mxu1 }
 0x1d4   :  { %v248_v43 = vadd.f32 %v1041_v13, %v247_v41 }
 0x1d6   :  { %v279_v45 = vmax.f32 %v248_v43, 0.0  ;;  %v399_v43 = vmul.f32 %v1098_v15, %v351_v12 }
 0x1d8   :  { %713 = vmatmul.msk.f32.gmra.mxu2 %vm56_vm0, %v278_v42 }
 0x1db   :  { %v250_v44 = vpop.f32.mrf.mxu1 }
 0x1dc   :  { %v251_v46 = vadd.f32 %v1041_v13, %v250_v44 }
 0x1de   :  { %v280_v48 = vmax.f32 %v251_v46, 0.0  ;;  %v400_v46 = vmul.f32 %v1098_v15, %v356_v61  ;;  %v404_v61 = vmul.f32 %v1098_v15, %v1088_v1 }
 0x1e0   :  { %714 = vmatmul.msk.f32.gmra.mxu2 %vm56_vm0, %v279_v45 }
 0x1e3   :  { %v253_v47 = vpop.f32.mrf.mxu1 }
 0x1e4   :  { %v254_v49 = vadd.f32 %v1041_v13, %v253_v47 }
 0x1e6   :  { %v281_v52 = vmax.f32 %v254_v49, 0.0  ;;  %v401_v49 = vmul.f32 %v1098_v15, %v361_v2 }
 0x1e8   :  { %715 = vmatmul.msk.f32.gmra.mxu2 %vm56_vm0, %v280_v48 }
 0x1eb   :  { %v256_v50 = vpop.f32.mrf.mxu1 }
 0x1ec   :  { %v257_v53 = vadd.f32 %v1041_v13, %v256_v50 }
 0x1ee   :  { %v282_v55 = vmax.f32 %v257_v53, 0.0  ;;  %v402_v53 = vmul.f32 %v1098_v15, %v1084_v60  ;;  %v405_v60 = vmul.f32 %v1098_v15, %v1080_v56 }
 0x1f0   :  { %716 = vmatmul.msk.f32.gmra.mxu2 %vm56_vm0, %v281_v52 }
 0x1f3   :  { %v259_v54 = vpop.f32.mrf.mxu1 }
 0x1f4   :  { %v260_v57 = vadd.f32 %v1041_v13, %v259_v54 }
 0x1f6   :  { %v283_v59 = vmax.f32 %v260_v57, 0.0  ;;  %v403_v57 = vmul.f32 %v1098_v15, %v371_v7 }
 0x1f8   :  { %717 = vmatmul.msk.f32.gmra.mxu2 %vm56_vm0, %v282_v55 }
 0x1fb   :  { %v262_v58 = vpop.f32.mrf.mxu1 }
 0x1fc   :  { %v263_v62 = vadd.f32 %v1041_v13, %v262_v58 }
 0x1fe   :  { %v284_v0 = vmax.f32 %v263_v62, 0.0 }
 0x200   :  { %718 = vmatmul.msk.f32.gmra.mxu2 %vm56_vm0, %v283_v59 }
 0x203   :  { %v265_v63 = vpop.f32.mrf.mxu1 }
 0x204   :  { %v266_v3 = vadd.f32 %v1041_v13, %v265_v63 }
 0x206   :  { %v285_v5 = vmax.f32 %v266_v3, 0.0  ;;  %v406_v3 = vmul.f32 %v1098_v15, %v1076_v51 }
 0x208   :  { %719 = vmatmul.msk.f32.gmra.mxu2 %vm56_vm0, %v284_v0 }
 0x20b   :  { %v268_v6 = vpop.f32.mrf.mxu1 }
 0x20c   :  { %v269_v8 = vadd.f32 %v1041_v13, %v268_v6  ;;  %v392_v13 = vmul.f32 %v1098_v15, %v316_v21 }
 0x20e   :  { %v286_v11 = vmax.f32 %v269_v8, 0.0 }
 0x210   :  { %720 = vmatmul.msk.f32.gmra.mxu2 %vm56_vm0, %v285_v5 }
 0x218   :  { %721 = vmatmul.msk.f32.gmra.mxu2 %vm56_vm0, %v286_v11 }
 0x223   :  { %v472_v18 = vpop.f32.mrf.mxu2 }
 0x224   :  { %v473_v20 = vadd.f32 %v472_v18, %v391_v17  ;;  %v755_v17 = vld [vmem:[%s1253_s1] sm:$0xff]  }
 0x225   :  { %v757_v21 = vunpack.c.h.bf16 %v755_v17 }
 0x226   :  { %520 = vst.msk [vmem:[#allocation2] sm:$0xff] %vm56_vm0, %v473_v20  ;;  %v756_v20 = vunpack.c.l.bf16 %v755_v17 }
 0x22b   :  { %v475_v22 = vpop.f32.mrf.mxu2 }
 0x22c   :  { %v476_v23 = vadd.f32 %v475_v22, %v392_v13  ;;  %v793_v22 = vld [vmem:[%s1253_s1 + $0x8] sm:$0xff]  }
 0x22d   :  { %v568_v13 = vld [vmem:[#allocation2] sm:$0xff]  ;;  %v761_v24 = vunpack.c.h.bf16 %v793_v22 }
 0x22e   :  { %521 = vst.msk [vmem:[#allocation2 + $0x8] sm:$0xff] %vm56_vm0, %v476_v23  ;;  %v760_v23 = vunpack.c.l.bf16 %v793_v22 }
 0x233   :  { %v478_v26 = vpop.f32.mrf.mxu2 }
 0x234   :  { %v479_v27 = vadd.f32 %v478_v26, %v393_v25  ;;  %v794_v25 = vld [vmem:[%s1253_s1 + $0x10] sm:$0xff]  }
 0x235   :  { %v569_v19 = vld [vmem:[#allocation2 + $0x8] sm:$0xff]  ;;  %v764_v26 = vunpack.c.l.bf16 %v794_v25 }
 0x236   :  { %522 = vst.msk [vmem:[#allocation2 + $0x10] sm:$0xff] %vm56_vm0, %v479_v27  ;;  %v765_v27 = vunpack.c.h.bf16 %v794_v25 }
 0x23b   :  { %v481_v29 = vpop.f32.mrf.mxu2 }
 0x23c   :  { %v482_v30 = vadd.f32 %v481_v29, %v394_v28  ;;  %v795_v28 = vld [vmem:[%s1253_s1 + $0x18] sm:$0xff]  }
 0x23d   :  { %v570_v18 = vld [vmem:[#allocation2 + $0x10] sm:$0xff]  ;;  %v768_v29 = vunpack.c.l.bf16 %v795_v28 }
 0x23e   :  { %523 = vst.msk [vmem:[#allocation2 + $0x18] sm:$0xff] %vm56_vm0, %v482_v30  ;;  %v769_v30 = vunpack.c.h.bf16 %v795_v28 }
 0x243   :  { %v484_v32 = vpop.f32.mrf.mxu2 }
 0x244   :  { %v485_v33 = vadd.f32 %v484_v32, %v395_v31  ;;  %v796_v31 = vld [vmem:[%s1253_s1 + $0x20] sm:$0xff]  }
 0x245   :  { %v571_v16 = vld [vmem:[#allocation2 + $0x18] sm:$0xff]  ;;  %v772_v32 = vunpack.c.l.bf16 %v796_v31 }
 0x246   :  { %524 = vst.msk [vmem:[#allocation2 + $0x20] sm:$0xff] %vm56_vm0, %v485_v33  ;;  %v773_v33 = vunpack.c.h.bf16 %v796_v31 }
 0x24b   :  { %v487_v35 = vpop.f32.mrf.mxu2 }
 0x24c   :  { %v488_v36 = vadd.f32 %v487_v35, %v396_v34  ;;  %v797_v34 = vld [vmem:[%s1253_s1 + $0x28] sm:$0xff]  }
 0x24d   :  { %v572_v15 = vld [vmem:[#allocation2 + $0x20] sm:$0xff]  ;;  %v776_v35 = vunpack.c.l.bf16 %v797_v34 }
 0x24e   :  { %525 = vst.msk [vmem:[#allocation2 + $0x28] sm:$0xff] %vm56_vm0, %v488_v36  ;;  %v777_v36 = vunpack.c.h.bf16 %v797_v34 }
 0x253   :  { %v490_v38 = vpop.f32.mrf.mxu2 }
 0x254   :  { %v491_v39 = vadd.f32 %v490_v38, %v397_v37  ;;  %v798_v37 = vld [vmem:[%s1253_s1 + $0x30] sm:$0xff]  }
 0x255   :  { %v573_v14 = vld [vmem:[#allocation2 + $0x28] sm:$0xff]  ;;  %v780_v38 = vunpack.c.l.bf16 %v798_v37 }
 0x256   :  { %526 = vst.msk [vmem:[#allocation2 + $0x30] sm:$0xff] %vm56_vm0, %v491_v39  ;;  %v781_v39 = vunpack.c.h.bf16 %v798_v37 }
 0x25b   :  { %v493_v41 = vpop.f32.mrf.mxu2 }
 0x25c   :  { %v494_v42 = vadd.f32 %v493_v41, %v398_v40  ;;  %v799_v40 = vld [vmem:[%s1253_s1 + $0x38] sm:$0xff]  }
 0x25d   :  { %v574_v12 = vld [vmem:[#allocation2 + $0x30] sm:$0xff]  ;;  %v784_v41 = vunpack.c.l.bf16 %v799_v40 }
 0x25e   :  { %527 = vst.msk [vmem:[#allocation2 + $0x38] sm:$0xff] %vm56_vm0, %v494_v42  ;;  %v785_v42 = vunpack.c.h.bf16 %v799_v40 }
 0x263   :  { %v496_v44 = vpop.f32.mrf.mxu2 }
 0x264   :  { %v497_v45 = vadd.f32 %v496_v44, %v399_v43  ;;  %v1163_v43 = vld [vmem:[%s1252_s8] ss:$0 sm:$0xff] }
 0x265   :  { %v575_v11 = vld [vmem:[#allocation2 + $0x38] sm:$0xff] }
 0x266   :  { %528 = vst.msk [vmem:[#allocation2 + $0x40] sm:$0xff] %vm56_vm0, %v497_v45 }
 0x26b   :  { %v499_v47 = vpop.f32.mrf.mxu2 }
 0x26c   :  { %v500_v48 = vadd.f32 %v499_v47, %v400_v46 }
 0x26d   :  { %v576_v10 = vld [vmem:[#allocation2 + $0x40] sm:$0xff] }
 0x26e   :  { %529 = vst.msk [vmem:[#allocation2 + $0x48] sm:$0xff] %vm56_vm0, %v500_v48 }
 0x273   :  { %v502_v50 = vpop.f32.mrf.mxu2 }
 0x274   :  { %v503_v52 = vadd.f32 %v502_v50, %v401_v49 }
 0x275   :  { %v577_v9 = vld [vmem:[#allocation2 + $0x48] sm:$0xff] }
 0x276   :  { %530 = vst.msk [vmem:[#allocation2 + $0x50] sm:$0xff] %vm56_vm0, %v503_v52 }
 0x27b   :  { %v505_v54 = vpop.f32.mrf.mxu2 }
 0x27c   :  { %v506_v55 = vadd.f32 %v505_v54, %v402_v53 }
 0x27d   :  { %v578_v51 = vld [vmem:[#allocation2 + $0x50] sm:$0xff] }
 0x27e   :  { %531 = vst.msk [vmem:[#allocation2 + $0x58] sm:$0xff] %vm56_vm0, %v506_v55 }
 0x283   :  { %v508_v58 = vpop.f32.mrf.mxu2 }
 0x284   :  { %v509_v59 = vadd.f32 %v508_v58, %v403_v57 }
 0x285   :  { %v579_v8 = vld [vmem:[#allocation2 + $0x58] sm:$0xff] }
 0x286   :  { %532 = vst.msk [vmem:[#allocation2 + $0x60] sm:$0xff] %vm56_vm0, %v509_v59 }
 0x28b   :  { %v511_v62 = vpop.f32.mrf.mxu2 }
 0x28c   :  { %v512_v63 = vadd.f32 %v511_v62, %v404_v61 }
 0x28d   :  { %v580_v56 = vld [vmem:[#allocation2 + $0x60] sm:$0xff] }
 0x28e   :  { %533 = vst.msk [vmem:[#allocation2 + $0x68] sm:$0xff] %vm56_vm0, %v512_v63 }
 0x293   :  { %v514_v0 = vpop.f32.mrf.mxu2 }
 0x294   :  { %v515_v2 = vadd.f32 %v514_v0, %v405_v60 }
 0x295   :  { %v581_v7 = vld [vmem:[#allocation2 + $0x68] sm:$0xff] }
 0x296   :  { %534 = vst.msk [vmem:[#allocation2 + $0x70] sm:$0xff] %vm56_vm0, %v515_v2 }
 0x29b   :  { %v517_v4 = vpop.f32.mrf.mxu2 }
 0x29c   :  { %v518_v5 = vadd.f32 %v517_v4, %v406_v3 }
 0x29d   :  { %v582_v1 = vld [vmem:[#allocation2 + $0x70] sm:$0xff] }
 0x29e   :  { %535 = vst.msk [vmem:[#allocation2 + $0x78] sm:$0xff] %vm56_vm0, %v518_v5 }
 0x2a5   :  { %v583_v6 = vld [vmem:[#allocation2 + $0x78] sm:$0xff] }
 0x2a6   :  { %588 = vmatpush.msrb.mxu2 %v583_v6  ;;  %816 = vmatpush.msra.mxu3 %v583_v6 }
 0x2a8   :  { %589 = vmatpush.msrb.mxu2 %v582_v1  ;;  %817 = vmatpush.msra.mxu3 %v582_v1 }
 0x2aa   :  { %590 = vmatpush.msrb.mxu2 %v581_v7  ;;  %818 = vmatpush.msra.mxu3 %v581_v7 }
 0x2ac   :  { %591 = vmatpush.msrb.mxu2 %v580_v56  ;;  %819 = vmatpush.msra.mxu3 %v580_v56 }
 0x2ae   :  { %592 = vmatpush.msrb.mxu2 %v579_v8  ;;  %820 = vmatpush.msra.mxu3 %v579_v8 }
 0x2b0   :  { %593 = vmatpush.msrb.mxu2 %v578_v51  ;;  %821 = vmatpush.msra.mxu3 %v578_v51 }
 0x2b2   :  { %594 = vmatpush.msrb.mxu2 %v577_v9  ;;  %822 = vmatpush.msra.mxu3 %v577_v9 }
 0x2b4   :  { %595 = vmatpush.msrb.mxu2 %v576_v10  ;;  %823 = vmatpush.msra.mxu3 %v576_v10 }
 0x2b6   :  { %596 = vmatpush.msrb.mxu2 %v575_v11  ;;  %824 = vmatpush.msra.mxu3 %v575_v11 }
 0x2b8   :  { %597 = vmatpush.msrb.mxu2 %v574_v12  ;;  %825 = vmatpush.msra.mxu3 %v574_v12 }
 0x2ba   :  { %598 = vmatpush.msrb.mxu2 %v573_v14  ;;  %826 = vmatpush.msra.mxu3 %v573_v14 }
 0x2bc   :  { %599 = vmatpush.msrb.mxu2 %v572_v15  ;;  %827 = vmatpush.msra.mxu3 %v572_v15 }
 0x2be   :  { %600 = vmatpush.msrb.mxu2 %v571_v16  ;;  %828 = vmatpush.msra.mxu3 %v571_v16 }
 0x2c0   :  { %601 = vmatpush.msrb.mxu2 %v570_v18  ;;  %829 = vmatpush.msra.mxu3 %v570_v18 }
 0x2c2   :  { %602 = vmatpush.msrb.mxu2 %v569_v19  ;;  %830 = vmatpush.msra.mxu3 %v569_v19 }
 0x2c4   :  { %603 = vmatpush.msrb.mxu2 %v568_v13  ;;  %831 = vmatpush.msra.mxu3 %v568_v13 }
 0x2c5   :  { %607 = vmatmul.f32.vlgmr.msra.gmra.mxu3 %v757_v21  ;;  %604 = vmatmul.f32.vlgmr.msrb.gmra.mxu2 %v756_v20 }
 0x2cd   :  { %610 = vmatmul.f32.gmra.mxu3 %v760_v23 }
 0x2d5   :  { %613 = vmatmul.f32.gmra.mxu3 %v761_v24 }
 0x2dd   :  { %616 = vmatmul.f32.gmra.mxu3 %v764_v26 }
 0x2e5   :  { %619 = vmatmul.f32.gmra.mxu3 %v765_v27 }
 0x2ed   :  { %622 = vmatmul.f32.gmra.mxu3 %v768_v29 }
 0x2f5   :  { %625 = vmatmul.f32.gmra.mxu3 %v769_v30 }
 0x2fd   :  { %628 = vmatmul.f32.gmra.mxu3 %v772_v32 }
 0x305   :  { %631 = vmatmul.f32.gmra.mxu3 %v773_v33 }
 0x30d   :  { %634 = vmatmul.f32.gmra.mxu3 %v776_v35 }
 0x315   :  { %637 = vmatmul.f32.gmra.mxu3 %v777_v36 }
 0x31d   :  { %640 = vmatmul.f32.gmra.mxu3 %v780_v38 }
 0x325   :  { %643 = vmatmul.f32.gmra.mxu3 %v781_v39 }
 0x32d   :  { %646 = vmatmul.f32.gmra.mxu3 %v784_v41 }
 0x335   :  { %649 = vmatmul.f32.gmra.mxu3 %v785_v42 }
 0x348   :  { %v608_v44 = vpop.f32.mrf.mxu3  ;;  %v605_v10 = vpop.f32.mrf.mxu2 }
 0x349   :  { %v609_v45 = vadd.f32 %v1163_v43, %v608_v44  ;;  %v606_v11 = vadd.f32 %v1163_v43, %v605_v10 }
 0x34b   :  { %v654_v46 = vmax.f32 %v609_v45, 0.0  ;;  %v653_v14 = vmax.f32 %v606_v11, 0.0 }
 0x34d   :  { %671 = vst.msk [vmem:[%s1254_s9 + $0x8] sm:$0xff] %vm56_vm0, %v654_v46 }
 0x34e   :  { %670 = vst.msk [vmem:[%s1254_s9] sm:$0xff] %vm56_vm0, %v653_v14 }
 0x350   :  { %v611_v47 = vpop.f32.mrf.mxu3 }
 0x351   :  { %v612_v48 = vadd.f32 %v1163_v43, %v611_v47 }
 0x353   :  { %v655_v49 = vmax.f32 %v612_v48, 0.0 }
 0x355   :  { %672 = vst.msk [vmem:[%s1254_s9 + $0x10] sm:$0xff] %vm56_vm0, %v655_v49 }
 0x358   :  { %v614_v50 = vpop.f32.mrf.mxu3 }
 0x359   :  { %v615_v52 = vadd.f32 %v1163_v43, %v614_v50 }
 0x35b   :  { %v656_v53 = vmax.f32 %v615_v52, 0.0 }
 0x35d   :  { %673 = vst.msk [vmem:[%s1254_s9 + $0x18] sm:$0xff] %vm56_vm0, %v656_v53 }
 0x360   :  { %v617_v54 = vpop.f32.mrf.mxu3 }
 0x361   :  { %v618_v55 = vadd.f32 %v1163_v43, %v617_v54 }
 0x363   :  { %v657_v57 = vmax.f32 %v618_v55, 0.0 }
 0x365   :  { %674 = vst.msk [vmem:[%s1254_s9 + $0x20] sm:$0xff] %vm56_vm0, %v657_v57 }
 0x368   :  { %v620_v58 = vpop.f32.mrf.mxu3 }
 0x369   :  { %v621_v59 = vadd.f32 %v1163_v43, %v620_v58 }
 0x36b   :  { %v658_v61 = vmax.f32 %v621_v59, 0.0 }
 0x36d   :  { %675 = vst.msk [vmem:[%s1254_s9 + $0x28] sm:$0xff] %vm56_vm0, %v658_v61 }
 0x370   :  { %v623_v62 = vpop.f32.mrf.mxu3 }
 0x371   :  { %v624_v63 = vadd.f32 %v1163_v43, %v623_v62 }
 0x373   :  { %v659_v60 = vmax.f32 %v624_v63, 0.0 }
 0x375   :  { %676 = vst.msk [vmem:[%s1254_s9 + $0x30] sm:$0xff] %vm56_vm0, %v659_v60 }
 0x378   :  { %v626_v0 = vpop.f32.mrf.mxu3 }
 0x379   :  { %v627_v2 = vadd.f32 %v1163_v43, %v626_v0 }
 0x37b   :  { %v660_v3 = vmax.f32 %v627_v2, 0.0 }
 0x37d   :  { %677 = vst.msk [vmem:[%s1254_s9 + $0x38] sm:$0xff] %vm56_vm0, %v660_v3 }
 0x380   :  { %v629_v4 = vpop.f32.mrf.mxu3 }
 0x381   :  { %v630_v5 = vadd.f32 %v1163_v43, %v629_v4 }
 0x383   :  { %v661_v6 = vmax.f32 %v630_v5, 0.0 }
 0x385   :  { %678 = vst.msk [vmem:[%s1254_s9 + $0x40] sm:$0xff] %vm56_vm0, %v661_v6 }
 0x388   :  { %v632_v1 = vpop.f32.mrf.mxu3 }
 0x389   :  { %v633_v7 = vadd.f32 %v1163_v43, %v632_v1 }
 0x38b   :  { %v662_v56 = vmax.f32 %v633_v7, 0.0 }
 0x38d   :  { %679 = vst.msk [vmem:[%s1254_s9 + $0x48] sm:$0xff] %vm56_vm0, %v662_v56 }
 0x390   :  { %v635_v8 = vpop.f32.mrf.mxu3 }
 0x391   :  { %v636_v51 = vadd.f32 %v1163_v43, %v635_v8 }
 0x393   :  { %v663_v9 = vmax.f32 %v636_v51, 0.0 }
 0x395   :  { %680 = vst.msk [vmem:[%s1254_s9 + $0x50] sm:$0xff] %vm56_vm0, %v663_v9 }
 0x398   :  { %v638_v12 = vpop.f32.mrf.mxu3 }
 0x399   :  { %v639_v15 = vadd.f32 %v1163_v43, %v638_v12 }
 0x39b   :  { %v664_v16 = vmax.f32 %v639_v15, 0.0 }
 0x39d   :  { %681 = vst.msk [vmem:[%s1254_s9 + $0x58] sm:$0xff] %vm56_vm0, %v664_v16 }
 0x3a0   :  { %v641_v17 = vpop.f32.mrf.mxu3 }
 0x3a1   :  { %v642_v18 = vadd.f32 %v1163_v43, %v641_v17 }
 0x3a3   :  { %v665_v19 = vmax.f32 %v642_v18, 0.0 }
 0x3a5   :  { %682 = vst.msk [vmem:[%s1254_s9 + $0x60] sm:$0xff] %vm56_vm0, %v665_v19 }
 0x3a8   :  { %v644_v20 = vpop.f32.mrf.mxu3 }
 0x3a9   :  { %v645_v21 = vadd.f32 %v1163_v43, %v644_v20 }
 0x3ab   :  { %v666_v13 = vmax.f32 %v645_v21, 0.0 }
 0x3ad   :  { %683 = vst.msk [vmem:[%s1254_s9 + $0x68] sm:$0xff] %vm56_vm0, %v666_v13 }
 0x3b0   :  { %v647_v22 = vpop.f32.mrf.mxu3 }
 0x3b1   :  { %v648_v23 = vadd.f32 %v1163_v43, %v647_v22 }
 0x3b3   :  { %v667_v24 = vmax.f32 %v648_v23, 0.0 }
 0x3b5   :  { %684 = vst.msk [vmem:[%s1254_s9 + $0x70] sm:$0xff] %vm56_vm0, %v667_v24 }
 0x3b8   :  { %v650_v25 = vpop.f32.mrf.mxu3 }
 0x3b9   :  { %v651_v26 = vadd.f32 %v1163_v43, %v650_v25 }
 0x3bb   :  { %v668_v27 = vmax.f32 %v651_v26, 0.0 }
 0x3bd   :  { %685 = vst.msk [vmem:[%s1254_s9 + $0x78] sm:$0xff] %vm56_vm0, %v668_v27 }

</bundles_post_ra>
